<compile_context>
chip_gen: v6e
topology: v6e:2x2x1
jax: 0.10.0
libtpu: 0.0.40
codegen_flags: <defaults>
</compile_context>

<pallas_src>
import functools

import jax
import jax.numpy as jnp
from jax.experimental import pallas as pl
from jax.experimental.pallas import tpu as pltpu

LANE = 128          # f32/bf16 lane width: every slab's last dim is a multiple
TILE = 256          # row / contraction tile for the O(N^2) aggregation


def _round_up(v, m):
    return (v + m - 1) // m * m


def _node_padding(num_nodes):
    """Pad node count so the tile size divides it exactly (lane-dense)."""
    if num_nodes <= TILE:
        n_pad = _round_up(num_nodes, LANE)
        return n_pad, n_pad
    return _round_up(num_nodes, TILE), TILE


# --------------------------------------------------------------------------- #
# Kernel 1: one GCN layer, tiled over (row blocks, contraction blocks).
#   H[i] = relu( (sum_k A_hat[i,k] @ X[k]) @ W + b )
# Padded-row/column invariant: A_hat's padded rows/cols and X's padded cols are
# zero, W's padded cols and b's padded entries are zero, so padded rows only
# hold relu(b) and padded columns stay exactly zero (never read downstream).
# --------------------------------------------------------------------------- #
def _gcn_layer_kernel(a_ref, x_ref, w_ref, b_ref, h_ref, acc_ref, *, bias_row):
    k = pl.program_id(1)

    @pl.when(k == 0)
    def _():
        acc_ref[...] = jnp.zeros_like(acc_ref)

    # O(N^2) aggregation block: bf16 x bf16 -> f32 accumulate (MXU).
    acc_ref[...] += jnp.dot(a_ref[...], x_ref[...],
                            preferred_element_type=jnp.float32)

    @pl.when(k == pl.num_programs(1) - 1)
    def _():
        b = b_ref[bias_row:bias_row + 1, :]
        h = jnp.dot(acc_ref[...], w_ref[...],
                    preferred_element_type=jnp.float32) + b
        h_ref[...] = jnp.maximum(h, 0.0).astype(h_ref.dtype)


def _gcn_layer(a_pad, x_pad, w_pad, b_slab, *, bias_row, out_dtype):
    n_pad = a_pad.shape[0]
    d_pad = x_pad.shape[1]
    h_lane = w_pad.shape[1]
    tm = min(TILE, n_pad)
    tk = min(TILE, n_pad)
    grid = (n_pad // tm, n_pad // tk)

    out_isz = jnp.dtype(out_dtype).itemsize
    flops = 2 * n_pad * n_pad * d_pad + 2 * n_pad * d_pad * h_lane
    bytes_accessed = int(a_pad.size * 2 + x_pad.size * 2 + w_pad.size * 4
                         + b_slab.size * 4 + n_pad * h_lane * out_isz)
    vmem_need = (2 * tm * tk * 2 + 2 * tk * d_pad * 2        # bf16 A, X blocks
                 + d_pad * h_lane * 4 + b_slab.size * 4      # resident W, bias
                 + 2 * tm * h_lane * out_isz                 # output blocks
                 + tm * d_pad * 4)                           # f32 accumulator

    return pl.pallas_call(
        functools.partial(_gcn_layer_kernel, bias_row=bias_row),
        out_shape=jax.ShapeDtypeStruct((n_pad, h_lane), out_dtype),
        grid=grid,
        in_specs=[pl.BlockSpec((tm, tk), lambda i, k: (i, k)),
                  pl.BlockSpec((tk, d_pad), lambda i, k: (k, 0)),
                  pl.BlockSpec((d_pad, h_lane), lambda i, k: (0, 0)),
                  pl.BlockSpec((8, h_lane), lambda i, k: (0, 0))],
        out_specs=pl.BlockSpec((tm, h_lane), lambda i, k: (i, 0)),
        scratch_shapes=[pltpu.VMEM((tm, d_pad), jnp.float32)],
        compiler_params=pltpu.CompilerParams(
            dimension_semantics=("parallel", "arbitrary"),
            vmem_limit_bytes=int(max(2 * vmem_need, 8 << 20))),
        cost_estimate=pl.CostEstimate(flops=flops, transcendentals=0,
                                      bytes_accessed=bytes_accessed),
    )(a_pad, x_pad, w_pad, b_slab)


# --------------------------------------------------------------------------- #
# Kernel 2: mean-pool (reduction over node blocks) + fc1 + relu + output head.
#   pooled = pool @ H2 ;  y = relu(pooled @ Wfc + bfc) ;  out = y . w_out + b_out
# The degenerate (G,64)@(64,1) output matmul is a VPU multiply + lane reduce.
# --------------------------------------------------------------------------- #
def _head_kernel(pool_ref, h_ref, wfc_ref, pvec_ref, o_ref, acc_ref):
    k = pl.program_id(0)

    @pl.when(k == 0)
    def _():
        acc_ref[...] = jnp.zeros_like(acc_ref)

    acc_ref[...] += jnp.dot(pool_ref[...], h_ref[...],
                            preferred_element_type=jnp.float32)

    @pl.when(k == pl.num_programs(0) - 1)
    def _():
        bfc = pvec_ref[0:1, :]
        w_out = pvec_ref[1:2, :]
        b_out = pvec_ref[2:3, 0:1]
        y = jnp.maximum(jnp.dot(acc_ref[...], wfc_ref[...],
                                preferred_element_type=jnp.float32) + bfc, 0.0)
        r = jnp.sum(y * w_out, axis=-1, keepdims=True) + b_out
        o_ref[...] = jnp.broadcast_to(r, o_ref.shape)     # lane-dense store


def _head(pool_pad, h2, wfc_pad, pvec):
    g_pad, n_pad = pool_pad.shape
    h_lane = h2.shape[1]
    tk = min(TILE, n_pad)
    grid = (n_pad // tk,)
    vmem_need = (2 * g_pad * tk * 4 + 2 * tk * h_lane * 4
                 + wfc_pad.size * 4 + pvec.size * 4
                 + g_pad * LANE * 4 + g_pad * h_lane * 4)

    return pl.pallas_call(
        _head_kernel,
        out_shape=jax.ShapeDtypeStruct((g_pad, LANE), jnp.float32),
        grid=grid,
        in_specs=[pl.BlockSpec((g_pad, tk), lambda k: (0, k)),
                  pl.BlockSpec((tk, h_lane), lambda k: (k, 0)),
                  pl.BlockSpec((h_lane, LANE), lambda k: (0, 0)),
                  pl.BlockSpec((8, LANE), lambda k: (0, 0))],
        out_specs=pl.BlockSpec((g_pad, LANE), lambda k: (0, 0)),
        scratch_shapes=[pltpu.VMEM((g_pad, h_lane), jnp.float32)],
        compiler_params=pltpu.CompilerParams(
            dimension_semantics=("arbitrary",),
            vmem_limit_bytes=int(max(2 * vmem_need, 8 << 20))),
    )(pool_pad, h2, wfc_pad, pvec)


# --------------------------------------------------------------------------- #
# Graph-structure operators (edge_index / batch -> dense operators).
# --------------------------------------------------------------------------- #
def _build_graph_operators(edge_index, batch, num_nodes, num_graphs):
    src, dst = edge_index[0], edge_index[1]
    a = jnp.zeros((num_nodes, num_nodes), jnp.float32).at[dst, src].add(1.0)
    a = a + jnp.eye(num_nodes, dtype=jnp.float32)                 # self loops
    deg = jnp.sum(a, axis=1)
    dinv = 1.0 / jnp.sqrt(deg)                                    # deg >= 1
    a_hat = dinv[:, None] * a * dinv[None, :]

    onehot = (batch[None, :] == jnp.arange(num_graphs)[:, None]).astype(jnp.float32)
    pool = onehot / jnp.maximum(jnp.sum(onehot, axis=1, keepdims=True), 1.0)
    return a_hat, pool


def pack_graph(edge_index, batch, num_nodes, num_graphs):
    """Hoisted out of the per-call path: only rebuild when the graph changes."""
    n_pad, _ = _node_padding(num_nodes)
    g_pad = _round_up(num_graphs, 8)
    a_hat, pool = _build_graph_operators(edge_index, batch, num_nodes, num_graphs)
    a_pad = jnp.zeros((n_pad, n_pad), jnp.bfloat16)
    a_pad = a_pad.at[:num_nodes, :num_nodes].set(a_hat.astype(jnp.bfloat16))
    pool_pad = jnp.zeros((g_pad, n_pad), jnp.float32)
    pool_pad = pool_pad.at[:num_graphs, :num_nodes].set(pool)
    return a_pad, pool_pad


def pack_params(params, input_dim, hidden_dim=64):
    """Hoisted out of the per-call path: pack once at model load."""
    d_pad = _round_up(input_dim, LANE)
    h_lane = _round_up(hidden_dim, LANE)
    f = 64

    def pad2(a, rows, cols):
        out = jnp.zeros((rows, cols), jnp.float32)
        return out.at[:a.shape[0], :a.shape[1]].set(a.astype(jnp.float32))

    w1 = pad2(params["conv0_w"].T, d_pad, h_lane)        # (Dp, 128)
    w2 = pad2(params["conv1_w"].T, h_lane, h_lane)       # (128, 128)
    wfc = pad2(params["fc1_w"].T, h_lane, LANE)          # (128, 128)

    b_slab = jnp.zeros((8, h_lane), jnp.float32)
    b_slab = b_slab.at[0, :hidden_dim].set(params["conv0_b"])
    b_slab = b_slab.at[1, :hidden_dim].set(params["conv1_b"])

    pvec = jnp.zeros((8, LANE), jnp.float32)
    pvec = pvec.at[0, :f].set(params["fc1_b"])
    pvec = pvec.at[1, :f].set(params["out_w"][0])
    pvec = pvec.at[2, 0].set(params["out_b"][0])
    return {"w1": w1, "w2": w2, "wfc": wfc, "b_slab": b_slab, "pvec": pvec}


# --------------------------------------------------------------------------- #
# Forward: pad X, run 2 gridded GCN-layer kernels + 1 head kernel.
# --------------------------------------------------------------------------- #
def simple_gnn_forward(x, graph_ops, weights, *, num_graphs):
    a_pad, pool_pad = graph_ops
    n, d = x.shape
    n_pad = a_pad.shape[0]
    d_pad = weights["w1"].shape[0]

    x_pad = jnp.zeros((n_pad, d_pad), jnp.bfloat16)
    x_pad = x_pad.at[:n, :d].set(x.astype(jnp.bfloat16))

    # Layer 1: output bf16 (it is the O(N^2)-aggregated operand of layer 2).
    h1 = _gcn_layer(a_pad, x_pad, weights["w1"], weights["b_slab"],
                    bias_row=0, out_dtype=jnp.bfloat16)
    # Layer 2: output f32 (consumed once by the small head).
    h2 = _gcn_layer(a_pad, h1, weights["w2"], weights["b_slab"],
                    bias_row=1, out_dtype=jnp.float32)
    out_pad = _head(pool_pad, h2, weights["wfc"], weights["pvec"])
    return out_pad[:num_graphs, :1]


# --------------------------------------------------------------------------- #
# Pure-JAX references (f32 PyTorch semantics, and a bf16-quantization-matched
# variant mirroring exactly where the kernel casts to bf16).
# --------------------------------------------------------------------------- #
def _reference_forward(x, edge_index, batch, params, num_graphs, *, match_kernel=False):
    n = x.shape[0]
    a_hat, pool = _build_graph_operators(edge_index, batch, n, num_graphs)
    if match_kernel:
        q = lambda v: v.astype(jnp.bfloat16).astype(jnp.float32)
        a_hat = q(a_hat)
        xq = q(x.astype(jnp.float32))
        h1 = jnp.maximum((a_hat @ xq) @ params["conv0_w"].T + params["conv0_b"], 0.0)
        h1 = q(h1)
        h2 = jnp.maximum((a_hat @ h1) @ params["conv1_w"].T + params["conv1_b"], 0.0)
    else:
        h1 = jnp.maximum(a_hat @ (x @ params["conv0_w"].T) + params["conv0_b"], 0.0)
        h2 = jnp.maximum(a_hat @ (h1 @ params["conv1_w"].T) + params["conv1_b"], 0.0)
    gf = pool @ h2
    y = jnp.maximum(gf @ params["fc1_w"].T + params["fc1_b"], 0.0)
    return y @ params["out_w"].T + params["out_b"]


def init_params(key, input_dim, hidden_dim=64):
    """Deterministic PyTorch-style uniform init, PyTorch (out, in) layouts."""
    ks = jax.random.split(key, 8)

    def u(k, shape, fan_in):
        bound = 1.0 / jnp.sqrt(jnp.float32(fan_in))
        return jax.random.uniform(k, shape, jnp.float32, -bound, bound)

    H = hidden_dim
    return {
        "conv0_w": u(ks[0], (H, input_dim), input_dim),
        "conv0_b": u(ks[1], (H,), input_dim),
        "conv1_w": u(ks[2], (H, H), H),
        "conv1_b": u(ks[3], (H,), H),
        "fc1_w":   u(ks[4], (64, H), H),
        "fc1_b":   u(ks[5], (64,), H),
        "out_w":   u(ks[6], (1, 64), 64),
        "out_b":   u(ks[7], (1,), 64),
    }


if __name__ == "__main__":
    key = jax.random.PRNGKey(0)
    k_x, k_p = jax.random.split(key)

    # Two 8-node ring graphs batched together: 16 nodes, 16 input features.
    N, D, H, G = 16, 16, 64, 2
    x = jax.random.normal(k_x, (N, D), dtype=jnp.float32)
    batch = jnp.array([0] * 8 + [1] * 8, dtype=jnp.int32)

    src, dst = [], []
    for graph in range(G):
        base = graph * 8
        for i in range(8):
            u_node, v_node = base + i, base + (i + 1) % 8
            src += [u_node, v_node]
            dst += [v_node, u_node]
    edge_index = jnp.array([src, dst], dtype=jnp.int32)        # (2, 32)

    params = init_params(k_p, D, H)

    # Hoisted packing: params/graph -> padded lane-dense slabs, done once.
    weights = pack_params(params, D, H)
    graph_ops = pack_graph(edge_index, batch, N, G)

    fwd = jax.jit(functools.partial(simple_gnn_forward, num_graphs=G))
    out = jax.block_until_ready(fwd(x, graph_ops, weights))

    ref_match = _reference_forward(x, edge_index, batch, params, G, match_kernel=True)
    ref_f32 = _reference_forward(x, edge_index, batch, params, G, match_kernel=False)

    assert out.shape == (G, 1)
    # Tight check vs a reference that mirrors the kernel's bf16 cast points.
    assert jnp.allclose(out, ref_match, atol=2e-3, rtol=2e-3), "mismatch vs matched ref"
    # Loose check vs pure-f32 PyTorch semantics (bf16 A_hat/X stream deviation).
    assert jnp.allclose(out, ref_f32, atol=2e-2, rtol=2e-2), "mismatch vs f32 ref"

    print("KERNEL_OK")
</pallas_src>

<mosaic_0001>
module attributes {stable_mosaic.version = 11 : i64} {
  func.func @_gcn_layer_kernel(%arg0: i32, %arg1: i32, %arg2: memref<128x128xbf16, #tpu.memory_space<vmem>>, %arg3: memref<128x128xbf16, #tpu.memory_space<vmem>>, %arg4: memref<128x128xf32, #tpu.memory_space<vmem>>, %arg5: memref<8x128xf32, #tpu.memory_space<vmem>>, %arg6: memref<128x128xbf16, #tpu.memory_space<vmem>>, %arg7: memref<128x128xf32, #tpu.memory_space<vmem>>) attributes {dimension_semantics = [#tpu.dimension_semantics<parallel>, #tpu.dimension_semantics<arbitrary>], iteration_bounds = array<i64: 1, 1>, scalar_prefetch = 0 : i64, scratch_operands = 1 : i64, tpu.core_type = #tpu.core_type<tc>, window_params = [{transform_indices = @transform_0, window_bounds = array<i64: 128, 128>}, {transform_indices = @transform_1, window_bounds = array<i64: 128, 128>}, {pipeline_mode = #tpu.pipeline_mode<synchronous>, transform_indices = @transform_2, window_bounds = array<i64: 128, 128>}, {pipeline_mode = #tpu.pipeline_mode<synchronous>, transform_indices = @transform_3, window_bounds = array<i64: 8, 128>}, {transform_indices = @transform_4, window_bounds = array<i64: 128, 128>}]} {
    %c0_i32 = arith.constant 0 : i32
    %0 = arith.cmpi eq, %arg1, %c0_i32 : i32
    %1 = arith.extui %0 : i1 to i32
    %c0_i32_0 = arith.constant 0 : i32
    %2 = arith.cmpi ne, %1, %c0_i32_0 : i32
    scf.if %2 {
      %cst_10 = arith.constant 0.000000e+00 : f32
      %12 = vector.broadcast %cst_10 : f32 to vector<128x128xf32>
      %c0_11 = arith.constant 0 : index
      %c0_12 = arith.constant 0 : index
      %13 = vector.load %arg7[%c0_11, %c0_12] : memref<128x128xf32, #tpu.memory_space<vmem>>, vector<128x128xf32>
      tpu.vector_store %arg7[%c0_11, %c0_12], %12 {strides = array<i32>} : memref<128x128xf32, #tpu.memory_space<vmem>>, vector<128x128xf32>,
    } else {
    }
    %c0 = arith.constant 0 : index
    %c0_1 = arith.constant 0 : index
    %3 = vector.load %arg7[%c0, %c0_1] : memref<128x128xf32, #tpu.memory_space<vmem>>, vector<128x128xf32>
    %c0_2 = arith.constant 0 : index
    %c0_3 = arith.constant 0 : index
    %4 = vector.load %arg2[%c0_2, %c0_3] : memref<128x128xbf16, #tpu.memory_space<vmem>>, vector<128x128xbf16>
    %c0_4 = arith.constant 0 : index
    %c0_5 = arith.constant 0 : index
    %5 = vector.load %arg3[%c0_4, %c0_5] : memref<128x128xbf16, #tpu.memory_space<vmem>>, vector<128x128xbf16>
    %cst = arith.constant dense<0.000000e+00> : vector<128x128xf32>
    %6 = tpu.matmul %4, %5, %cst {dimension_numbers = #tpu.dot_dimension_numbers<[1], [0], [0], [1], [0, 0, 1, 1], [], []>} : vector<128x128xbf16>, vector<128x128xbf16>, vector<128x128xf32> -> vector<128x128xf32>
    %7 = arith.addf %3, %6 : vector<128x128xf32>
    %c0_6 = arith.constant 0 : index
    %c0_7 = arith.constant 0 : index
    %8 = vector.load %arg7[%c0_6, %c0_7] : memref<128x128xf32, #tpu.memory_space<vmem>>, vector<128x128xf32>
    tpu.vector_store %arg7[%c0_6, %c0_7], %7 {strides = array<i32>} : memref<128x128xf32, #tpu.memory_space<vmem>>, vector<128x128xf32>,
    %c0_i32_8 = arith.constant 0 : i32
    %9 = arith.cmpi eq, %arg1, %c0_i32_8 : i32
    %10 = arith.extui %9 : i1 to i32
    %c0_i32_9 = arith.constant 0 : i32
    %11 = arith.cmpi ne, %10, %c0_i32_9 : i32
    scf.if %11 {
      %c0_10 = arith.constant 0 : index
      %c0_11 = arith.constant 0 : index
      %12 = vector.load %arg5[%c0_10, %c0_11] : memref<8x128xf32, #tpu.memory_space<vmem>>, vector<1x128xf32>
      %c0_12 = arith.constant 0 : index
      %c0_13 = arith.constant 0 : index
      %13 = vector.load %arg7[%c0_12, %c0_13] : memref<128x128xf32, #tpu.memory_space<vmem>>, vector<128x128xf32>
      %c0_14 = arith.constant 0 : index
      %c0_15 = arith.constant 0 : index
      %14 = vector.load %arg4[%c0_14, %c0_15] : memref<128x128xf32, #tpu.memory_space<vmem>>, vector<128x128xf32>
      %cst_16 = arith.constant dense<0.000000e+00> : vector<128x128xf32>
      %15 = tpu.matmul %13, %14, %cst_16 {dimension_numbers = #tpu.dot_dimension_numbers<[1], [0], [0], [1], [0, 0, 1, 1], [], []>} : vector<128x128xf32>, vector<128x128xf32>, vector<128x128xf32> -> vector<128x128xf32>
      %16 = vector.broadcast %12 : vector<1x128xf32> to vector<128x128xf32>
      %17 = arith.addf %15, %16 : vector<128x128xf32>
      %cst_17 = arith.constant 0.000000e+00 : f32
      %18 = vector.broadcast %cst_17 : f32 to vector<128x128xf32>
      %19 = arith.maximumf %17, %18 : vector<128x128xf32>
      %20 = arith.truncf %19 : vector<128x128xf32> to vector<128x128xbf16>
      %c0_18 = arith.constant 0 : index
      %c0_19 = arith.constant 0 : index
      %21 = vector.load %arg6[%c0_18, %c0_19] : memref<128x128xbf16, #tpu.memory_space<vmem>>, vector<128x128xbf16>
      tpu.vector_store %arg6[%c0_18, %c0_19], %20 {strides = array<i32>} : memref<128x128xbf16, #tpu.memory_space<vmem>>, vector<128x128xbf16>,
    } else {
    }
    return
  }
  func.func @transform_0(%arg0: i32, %arg1: i32) -> (i32, i32) {
    %c0_i32 = arith.constant 0 : i32
    return %arg0, %arg1 : i32, i32
  }
  func.func @transform_1(%arg0: i32, %arg1: i32) -> (i32, i32) {
    %c0_i32 = arith.constant 0 : i32
    %c0_i32_0 = arith.constant 0 : i32
    return %arg1, %c0_i32 : i32, i32
  }
  func.func @transform_2(%arg0: i32, %arg1: i32) -> (i32, i32) {
    %c0_i32 = arith.constant 0 : i32
    %c0_i32_0 = arith.constant 0 : i32
    %c0_i32_1 = arith.constant 0 : i32
    return %c0_i32, %c0_i32_0 : i32, i32
  }
  func.func @transform_3(%arg0: i32, %arg1: i32) -> (i32, i32) {
    %c0_i32 = arith.constant 0 : i32
    %c0_i32_0 = arith.constant 0 : i32
    %c0_i32_1 = arith.constant 0 : i32
    return %c0_i32, %c0_i32_0 : i32, i32
  }
  func.func @transform_4(%arg0: i32, %arg1: i32) -> (i32, i32) {
    %c0_i32 = arith.constant 0 : i32
    %c0_i32_0 = arith.constant 0 : i32
    return %arg0, %c0_i32 : i32, i32
  }
}

module attributes {stable_mosaic.version = 11 : i64} {
  func.func @_gcn_layer_kernel(%arg0: i32, %arg1: i32, %arg2: memref<128x128xbf16, #tpu.memory_space<vmem>>, %arg3: memref<128x128xbf16, #tpu.memory_space<vmem>>, %arg4: memref<128x128xf32, #tpu.memory_space<vmem>>, %arg5: memref<8x128xf32, #tpu.memory_space<vmem>>, %arg6: memref<128x128xf32, #tpu.memory_space<vmem>>, %arg7: memref<128x128xf32, #tpu.memory_space<vmem>>) attributes {dimension_semantics = [#tpu.dimension_semantics<parallel>, #tpu.dimension_semantics<arbitrary>], iteration_bounds = array<i64: 1, 1>, scalar_prefetch = 0 : i64, scratch_operands = 1 : i64, tpu.core_type = #tpu.core_type<tc>, window_params = [{transform_indices = @transform_0, window_bounds = array<i64: 128, 128>}, {transform_indices = @transform_1, window_bounds = array<i64: 128, 128>}, {pipeline_mode = #tpu.pipeline_mode<synchronous>, transform_indices = @transform_2, window_bounds = array<i64: 128, 128>}, {pipeline_mode = #tpu.pipeline_mode<synchronous>, transform_indices = @transform_3, window_bounds = array<i64: 8, 128>}, {transform_indices = @transform_4, window_bounds = array<i64: 128, 128>}]} {
    %c0_i32 = arith.constant 0 : i32
    %0 = arith.cmpi eq, %arg1, %c0_i32 : i32
    %1 = arith.extui %0 : i1 to i32
    %c0_i32_0 = arith.constant 0 : i32
    %2 = arith.cmpi ne, %1, %c0_i32_0 : i32
    scf.if %2 {
      %cst_10 = arith.constant 0.000000e+00 : f32
      %12 = vector.broadcast %cst_10 : f32 to vector<128x128xf32>
      %c0_11 = arith.constant 0 : index
      %c0_12 = arith.constant 0 : index
      %13 = vector.load %arg7[%c0_11, %c0_12] : memref<128x128xf32, #tpu.memory_space<vmem>>, vector<128x128xf32>
      tpu.vector_store %arg7[%c0_11, %c0_12], %12 {strides = array<i32>} : memref<128x128xf32, #tpu.memory_space<vmem>>, vector<128x128xf32>,
    } else {
    }
    %c0 = arith.constant 0 : index
    %c0_1 = arith.constant 0 : index
    %3 = vector.load %arg7[%c0, %c0_1] : memref<128x128xf32, #tpu.memory_space<vmem>>, vector<128x128xf32>
    %c0_2 = arith.constant 0 : index
    %c0_3 = arith.constant 0 : index
    %4 = vector.load %arg2[%c0_2, %c0_3] : memref<128x128xbf16, #tpu.memory_space<vmem>>, vector<128x128xbf16>
    %c0_4 = arith.constant 0 : index
    %c0_5 = arith.constant 0 : index
    %5 = vector.load %arg3[%c0_4, %c0_5] : memref<128x128xbf16, #tpu.memory_space<vmem>>, vector<128x128xbf16>
    %cst = arith.constant dense<0.000000e+00> : vector<128x128xf32>
    %6 = tpu.matmul %4, %5, %cst {dimension_numbers = #tpu.dot_dimension_numbers<[1], [0], [0], [1], [0, 0, 1, 1], [], []>} : vector<128x128xbf16>, vector<128x128xbf16>, vector<128x128xf32> -> vector<128x128xf32>
    %7 = arith.addf %3, %6 : vector<128x128xf32>
    %c0_6 = arith.constant 0 : index
    %c0_7 = arith.constant 0 : index
    %8 = vector.load %arg7[%c0_6, %c0_7] : memref<128x128xf32, #tpu.memory_space<vmem>>, vector<128x128xf32>
    tpu.vector_store %arg7[%c0_6, %c0_7], %7 {strides = array<i32>} : memref<128x128xf32, #tpu.memory_space<vmem>>, vector<128x128xf32>,
    %c0_i32_8 = arith.constant 0 : i32
    %9 = arith.cmpi eq, %arg1, %c0_i32_8 : i32
    %10 = arith.extui %9 : i1 to i32
    %c0_i32_9 = arith.constant 0 : i32
    %11 = arith.cmpi ne, %10, %c0_i32_9 : i32
    scf.if %11 {
      %c1 = arith.constant 1 : index
      %c0_10 = arith.constant 0 : index
      %12 = vector.load %arg5[%c1, %c0_10] : memref<8x128xf32, #tpu.memory_space<vmem>>, vector<1x128xf32>
      %c0_11 = arith.constant 0 : index
      %c0_12 = arith.constant 0 : index
      %13 = vector.load %arg7[%c0_11, %c0_12] : memref<128x128xf32, #tpu.memory_space<vmem>>, vector<128x128xf32>
      %c0_13 = arith.constant 0 : index
      %c0_14 = arith.constant 0 : index
      %14 = vector.load %arg4[%c0_13, %c0_14] : memref<128x128xf32, #tpu.memory_space<vmem>>, vector<128x128xf32>
      %cst_15 = arith.constant dense<0.000000e+00> : vector<128x128xf32>
      %15 = tpu.matmul %13, %14, %cst_15 {dimension_numbers = #tpu.dot_dimension_numbers<[1], [0], [0], [1], [0, 0, 1, 1], [], []>} : vector<128x128xf32>, vector<128x128xf32>, vector<128x128xf32> -> vector<128x128xf32>
      %16 = vector.broadcast %12 : vector<1x128xf32> to vector<128x128xf32>
      %17 = arith.addf %15, %16 : vector<128x128xf32>
      %cst_16 = arith.constant 0.000000e+00 : f32
      %18 = vector.broadcast %cst_16 : f32 to vector<128x128xf32>
      %19 = arith.maximumf %17, %18 : vector<128x128xf32>
      %c0_17 = arith.constant 0 : index
      %c0_18 = arith.constant 0 : index
      %20 = vector.load %arg6[%c0_17, %c0_18] : memref<128x128xf32, #tpu.memory_space<vmem>>, vector<128x128xf32>
      tpu.vector_store %arg6[%c0_17, %c0_18], %19 {strides = array<i32>} : memref<128x128xf32, #tpu.memory_space<vmem>>, vector<128x128xf32>,
    } else {
    }
    return
  }
  func.func @transform_0(%arg0: i32, %arg1: i32) -> (i32, i32) {
    %c0_i32 = arith.constant 0 : i32
    return %arg0, %arg1 : i32, i32
  }
  func.func @transform_1(%arg0: i32, %arg1: i32) -> (i32, i32) {
    %c0_i32 = arith.constant 0 : i32
    %c0_i32_0 = arith.constant 0 : i32
    return %arg1, %c0_i32 : i32, i32
  }
  func.func @transform_2(%arg0: i32, %arg1: i32) -> (i32, i32) {
    %c0_i32 = arith.constant 0 : i32
    %c0_i32_0 = arith.constant 0 : i32
    %c0_i32_1 = arith.constant 0 : i32
    return %c0_i32, %c0_i32_0 : i32, i32
  }
  func.func @transform_3(%arg0: i32, %arg1: i32) -> (i32, i32) {
    %c0_i32 = arith.constant 0 : i32
    %c0_i32_0 = arith.constant 0 : i32
    %c0_i32_1 = arith.constant 0 : i32
    return %c0_i32, %c0_i32_0 : i32, i32
  }
  func.func @transform_4(%arg0: i32, %arg1: i32) -> (i32, i32) {
    %c0_i32 = arith.constant 0 : i32
    %c0_i32_0 = arith.constant 0 : i32
    return %arg0, %c0_i32 : i32, i32
  }
}

module attributes {stable_mosaic.version = 11 : i64} {
  func.func @_head_kernel(%arg0: i32, %arg1: memref<8x128xf32, #tpu.memory_space<vmem>>, %arg2: memref<128x128xf32, #tpu.memory_space<vmem>>, %arg3: memref<128x128xf32, #tpu.memory_space<vmem>>, %arg4: memref<8x128xf32, #tpu.memory_space<vmem>>, %arg5: memref<8x128xf32, #tpu.memory_space<vmem>>, %arg6: memref<8x128xf32, #tpu.memory_space<vmem>>) attributes {dimension_semantics = [#tpu.dimension_semantics<arbitrary>], iteration_bounds = array<i64: 1>, scalar_prefetch = 0 : i64, scratch_operands = 1 : i64, tpu.core_type = #tpu.core_type<tc>, window_params = [{transform_indices = @transform_0, window_bounds = array<i64: 8, 128>}, {transform_indices = @transform_1, window_bounds = array<i64: 128, 128>}, {pipeline_mode = #tpu.pipeline_mode<synchronous>, transform_indices = @transform_2, window_bounds = array<i64: 128, 128>}, {pipeline_mode = #tpu.pipeline_mode<synchronous>, transform_indices = @transform_3, window_bounds = array<i64: 8, 128>}, {pipeline_mode = #tpu.pipeline_mode<synchronous>, transform_indices = @transform_4, window_bounds = array<i64: 8, 128>}]} {
    %c0_i32 = arith.constant 0 : i32
    %0 = arith.cmpi eq, %arg0, %c0_i32 : i32
    %1 = arith.extui %0 : i1 to i32
    %c0_i32_0 = arith.constant 0 : i32
    %2 = arith.cmpi ne, %1, %c0_i32_0 : i32
    scf.if %2 {
      %cst_10 = arith.constant 0.000000e+00 : f32
      %12 = vector.broadcast %cst_10 : f32 to vector<8x128xf32>
      %c0_11 = arith.constant 0 : index
      %c0_12 = arith.constant 0 : index
      %13 = vector.load %arg6[%c0_11, %c0_12] : memref<8x128xf32, #tpu.memory_space<vmem>>, vector<8x128xf32>
      tpu.vector_store %arg6[%c0_11, %c0_12], %12 {strides = array<i32>} : memref<8x128xf32, #tpu.memory_space<vmem>>, vector<8x128xf32>,
    } else {
    }
    %c0 = arith.constant 0 : index
    %c0_1 = arith.constant 0 : index
    %3 = vector.load %arg6[%c0, %c0_1] : memref<8x128xf32, #tpu.memory_space<vmem>>, vector<8x128xf32>
    %c0_2 = arith.constant 0 : index
    %c0_3 = arith.constant 0 : index
    %4 = vector.load %arg1[%c0_2, %c0_3] : memref<8x128xf32, #tpu.memory_space<vmem>>, vector<8x128xf32>
    %c0_4 = arith.constant 0 : index
    %c0_5 = arith.constant 0 : index
    %5 = vector.load %arg2[%c0_4, %c0_5] : memref<128x128xf32, #tpu.memory_space<vmem>>, vector<128x128xf32>
    %cst = arith.constant dense<0.000000e+00> : vector<8x128xf32>
    %6 = tpu.matmul %4, %5, %cst {dimension_numbers = #tpu.dot_dimension_numbers<[1], [0], [0], [1], [0, 0, 1, 1], [], []>} : vector<8x128xf32>, vector<128x128xf32>, vector<8x128xf32> -> vector<8x128xf32>
    %7 = arith.addf %3, %6 : vector<8x128xf32>
    %c0_6 = arith.constant 0 : index
    %c0_7 = arith.constant 0 : index
    %8 = vector.load %arg6[%c0_6, %c0_7] : memref<8x128xf32, #tpu.memory_space<vmem>>, vector<8x128xf32>
    tpu.vector_store %arg6[%c0_6, %c0_7], %7 {strides = array<i32>} : memref<8x128xf32, #tpu.memory_space<vmem>>, vector<8x128xf32>,
    %c0_i32_8 = arith.constant 0 : i32
    %9 = arith.cmpi eq, %arg0, %c0_i32_8 : i32
    %10 = arith.extui %9 : i1 to i32
    %c0_i32_9 = arith.constant 0 : i32
    %11 = arith.cmpi ne, %10, %c0_i32_9 : i32
    scf.if %11 {
      %c0_10 = arith.constant 0 : index
      %c0_11 = arith.constant 0 : index
      %12 = vector.load %arg4[%c0_10, %c0_11] : memref<8x128xf32, #tpu.memory_space<vmem>>, vector<1x128xf32>
      %c1 = arith.constant 1 : index
      %c0_12 = arith.constant 0 : index
      %13 = vector.load %arg4[%c1, %c0_12] : memref<8x128xf32, #tpu.memory_space<vmem>>, vector<1x128xf32>
      %c2 = arith.constant 2 : index
      %c0_13 = arith.constant 0 : index
      %14 = vector.load %arg4[%c2, %c0_13] : memref<8x128xf32, #tpu.memory_space<vmem>>, vector<1x1xf32>
      %c0_14 = arith.constant 0 : index
      %c0_15 = arith.constant 0 : index
      %15 = vector.load %arg6[%c0_14, %c0_15] : memref<8x128xf32, #tpu.memory_space<vmem>>, vector<8x128xf32>
      %c0_16 = arith.constant 0 : index
      %c0_17 = arith.constant 0 : index
      %16 = vector.load %arg3[%c0_16, %c0_17] : memref<128x128xf32, #tpu.memory_space<vmem>>, vector<128x128xf32>
      %cst_18 = arith.constant dense<0.000000e+00> : vector<8x128xf32>
      %17 = tpu.matmul %15, %16, %cst_18 {dimension_numbers = #tpu.dot_dimension_numbers<[1], [0], [0], [1], [0, 0, 1, 1], [], []>} : vector<8x128xf32>, vector<128x128xf32>, vector<8x128xf32> -> vector<8x128xf32>
      %18 = vector.broadcast %12 : vector<1x128xf32> to vector<8x128xf32>
      %19 = arith.addf %17, %18 : vector<8x128xf32>
      %cst_19 = arith.constant 0.000000e+00 : f32
      %20 = vector.broadcast %cst_19 : f32 to vector<8x128xf32>
      %21 = arith.maximumf %19, %20 : vector<8x128xf32>
      %22 = vector.broadcast %13 : vector<1x128xf32> to vector<8x128xf32>
      %23 = arith.mulf %21, %22 : vector<8x128xf32>
      %cst_20 = arith.constant dense<0.000000e+00> : vector<8xf32>
      %24 = vector.multi_reduction <add>, %23, %cst_20 [1] : vector<8x128xf32> to vector<8xf32>
      %25 = vector.shape_cast %24 : vector<8xf32> to vector<8x1xf32>
      %26 = vector.broadcast %14 : vector<1x1xf32> to vector<8x1xf32>
      %27 = arith.addf %25, %26 : vector<8x1xf32>
      %28 = vector.shape_cast %27 : vector<8x1xf32> to vector<8x1xf32>
      %29 = vector.broadcast %28 : vector<8x1xf32> to vector<8x128xf32>
      %c0_21 = arith.constant 0 : index
      %c0_22 = arith.constant 0 : index
      %30 = vector.load %arg5[%c0_21, %c0_22] : memref<8x128xf32, #tpu.memory_space<vmem>>, vector<8x128xf32>
      tpu.vector_store %arg5[%c0_21, %c0_22], %29 {strides = array<i32>} : memref<8x128xf32, #tpu.memory_space<vmem>>, vector<8x128xf32>,
    } else {
    }
    return
  }
  func.func @transform_0(%arg0: i32) -> (i32, i32) {
    %c0_i32 = arith.constant 0 : i32
    %c0_i32_0 = arith.constant 0 : i32
    return %c0_i32, %arg0 : i32, i32
  }
  func.func @transform_1(%arg0: i32) -> (i32, i32) {
    %c0_i32 = arith.constant 0 : i32
    %c0_i32_0 = arith.constant 0 : i32
    return %arg0, %c0_i32 : i32, i32
  }
  func.func @transform_2(%arg0: i32) -> (i32, i32) {
    %c0_i32 = arith.constant 0 : i32
    %c0_i32_0 = arith.constant 0 : i32
    %c0_i32_1 = arith.constant 0 : i32
    return %c0_i32, %c0_i32_0 : i32, i32
  }
  func.func @transform_3(%arg0: i32) -> (i32, i32) {
    %c0_i32 = arith.constant 0 : i32
    %c0_i32_0 = arith.constant 0 : i32
    %c0_i32_1 = arith.constant 0 : i32
    return %c0_i32, %c0_i32_0 : i32, i32
  }
  func.func @transform_4(%arg0: i32) -> (i32, i32) {
    %c0_i32 = arith.constant 0 : i32
    %c0_i32_0 = arith.constant 0 : i32
    %c0_i32_1 = arith.constant 0 : i32
    return %c0_i32, %c0_i32_0 : i32, i32
  }
}

</mosaic_0001>

<bundles_post_ra>
// kernel: simple_gnn_forward.5
= control target key start
LH: loop header
LB: loop body
LE: loop exit
PB: predicated region body
PF: predicated region fallthrough
CT: control target
= control target key end

     0   :  { %v343_v0 = vmov 0.0   ;;  %vm344_vm0 = vmmov 0   ;;  %v345_v43 = vmov 0   ;;  %s516_s1 = inlined_call_operand.vmem [shape: f32[128,128], index: 1, kind: input, shape index: {}]   ;;  %s517_s2 = inlined_call_operand.vmem [shape: f32[128,128], index: 2, kind: input, shape index: {}]   ;;  %s518_s0 = inlined_call_operand.vmem [shape: f32[8,128], index: 0, kind: input, shape index: {}]   ;;  %s519_s3 = inlined_call_operand.vmem [shape: f32[8,128], index: 3, kind: input, shape index: {}]   ;;  %s520_s4 = inlined_call_operand.vmem [shape: f32[8,128], index: 4, kind: output, shape index: {}]  }
   0x1   :  { %269 = vmatprep.subr.mxu0 %v343_v0  ;;  %v39_v1 = vld [vmem:[%s516_s1 + $0x78] sm:$0xff]  ;;  %v38_v2 = vld [vmem:[%s516_s1 + $0x70] sm:$0xff]  ;;  %301 = vmatprep.mubr.msk.f32.mxu0 %vm344_vm0, %v343_v0  ;;  %v37_v3 = vld [vmem:[%s516_s1 + $0x68] sm:$0xff] }
   0x2   :  { %270 = vmatpush3.msra.mxu0 %v39_v1  ;;  %304 = vmatprep.subr.mxu1 %v343_v0  ;;  %v36_v4 = vld [vmem:[%s516_s1 + $0x60] sm:$0xff]  ;;  %v134_v5 = vld [vmem:[%s517_s2 + $0x78] sm:$0xff]  ;;  %v133_v7 = vld [vmem:[%s517_s2 + $0x70] sm:$0xff] }
   0x3   :  { %271 = vmatprep.subr.mxu0 %v343_v0  ;;  %336 = vmatprep.mubr.msk.f32.mxu1 %vm344_vm0, %v343_v0  ;;  %v35_v6 = vld [vmem:[%s516_s1 + $0x58] sm:$0xff]  ;;  %v132_v8 = vld [vmem:[%s517_s2 + $0x68] sm:$0xff]  ;;  %v34_v9 = vld [vmem:[%s516_s1 + $0x50] sm:$0xff] }
   0x4   :  { %272 = vmatpush3.msra.mxu0 %v38_v2  ;;  %305 = vmatpush3.msra.mxu1 %v134_v5  ;;  %v131_v10 = vld [vmem:[%s517_s2 + $0x60] sm:$0xff]  ;;  %v33_v11 = vld [vmem:[%s516_s1 + $0x48] sm:$0xff]  ;;  %v130_v12 = vld [vmem:[%s517_s2 + $0x58] sm:$0xff] }
   0x5   :  { %273 = vmatprep.subr.mxu0 %v343_v0  ;;  %306 = vmatprep.subr.mxu1 %v343_v0  ;;  %v32_v13 = vld [vmem:[%s516_s1 + $0x40] sm:$0xff]  ;;  %v129_v14 = vld [vmem:[%s517_s2 + $0x50] sm:$0xff]  ;;  %v31_v15 = vld [vmem:[%s516_s1 + $0x38] sm:$0xff] }
   0x6   :  { %274 = vmatpush3.msra.mxu0 %v37_v3  ;;  %307 = vmatpush3.msra.mxu1 %v133_v7  ;;  %v128_v16 = vld [vmem:[%s517_s2 + $0x48] sm:$0xff]  ;;  %v30_v17 = vld [vmem:[%s516_s1 + $0x30] sm:$0xff]  ;;  %v127_v18 = vld [vmem:[%s517_s2 + $0x40] sm:$0xff] }
   0x7   :  { %275 = vmatprep.subr.mxu0 %v343_v0  ;;  %308 = vmatprep.subr.mxu1 %v343_v0  ;;  %v29_v19 = vld [vmem:[%s516_s1 + $0x28] sm:$0xff]  ;;  %v126_v20 = vld [vmem:[%s517_s2 + $0x38] sm:$0xff]  ;;  %v28_v21 = vld [vmem:[%s516_s1 + $0x20] sm:$0xff] }
   0x8   :  { %276 = vmatpush3.msra.mxu0 %v36_v4  ;;  %309 = vmatpush3.msra.mxu1 %v132_v8  ;;  %v125_v22 = vld [vmem:[%s517_s2 + $0x30] sm:$0xff]  ;;  %v27_v23 = vld [vmem:[%s516_s1 + $0x18] sm:$0xff]  ;;  %v124_v24 = vld [vmem:[%s517_s2 + $0x28] sm:$0xff] }
   0x9   :  { %277 = vmatprep.subr.mxu0 %v343_v0  ;;  %310 = vmatprep.subr.mxu1 %v343_v0  ;;  %v26_v25 = vld [vmem:[%s516_s1 + $0x10] sm:$0xff]  ;;  %v123_v26 = vld [vmem:[%s517_s2 + $0x20] sm:$0xff]  ;;  %v25_v27 = vld [vmem:[%s516_s1 + $0x8] sm:$0xff] }
   0xa   :  { %278 = vmatpush3.msra.mxu0 %v35_v6  ;;  %311 = vmatpush3.msra.mxu1 %v131_v10  ;;  %v122_v28 = vld [vmem:[%s517_s2 + $0x18] sm:$0xff]  ;;  %v24_v29 = vld [vmem:[%s516_s1] sm:$0xff]  ;;  %v121_v31 = vld [vmem:[%s517_s2 + $0x10] sm:$0xff] }
   0xb   :  { %279 = vmatprep.subr.mxu0 %v343_v0  ;;  %312 = vmatprep.subr.mxu1 %v343_v0  ;;  %v23_v30 = vld [vmem:[%s518_s0] sm:$0xff]  ;;  %v120_v32 = vld [vmem:[%s517_s2 + $0x8] sm:$0xff] }
   0xc   :  { %280 = vmatpush3.msra.mxu0 %v34_v9  ;;  %313 = vmatpush3.msra.mxu1 %v130_v12  ;;  %v119_v33 = vld [vmem:[%s517_s2] sm:$0xff] }
   0xd   :  { %281 = vmatprep.subr.mxu0 %v343_v0  ;;  %314 = vmatprep.subr.mxu1 %v343_v0  ;;  %v232_v36 = vld [vmem:[%s519_s3] ss:$0 sm:$0xff]  ;;  %v233_v40 = vld [vmem:[%s519_s3 + $0x1] ss:$0 sm:$0xff]  ;;  %v234_v44 = vld [vmem:[%s519_s3 + $0x2] ss:$0 sm:$0xff] }
   0xe   :  { %282 = vmatpush3.msra.mxu0 %v33_v11  ;;  %315 = vmatpush3.msra.mxu1 %v129_v14 }
   0xf   :  { %283 = vmatprep.subr.mxu0 %v343_v0  ;;  %316 = vmatprep.subr.mxu1 %v343_v0 }
  0x10   :  { %284 = vmatpush3.msra.mxu0 %v32_v13  ;;  %317 = vmatpush3.msra.mxu1 %v128_v16 }
  0x11   :  { %285 = vmatprep.subr.mxu0 %v343_v0  ;;  %318 = vmatprep.subr.mxu1 %v343_v0 }
  0x12   :  { %286 = vmatpush3.msra.mxu0 %v31_v15  ;;  %319 = vmatpush3.msra.mxu1 %v127_v18 }
  0x13   :  { %287 = vmatprep.subr.mxu0 %v343_v0  ;;  %320 = vmatprep.subr.mxu1 %v343_v0 }
  0x14   :  { %288 = vmatpush3.msra.mxu0 %v30_v17  ;;  %321 = vmatpush3.msra.mxu1 %v126_v20 }
  0x15   :  { %289 = vmatprep.subr.mxu0 %v343_v0  ;;  %322 = vmatprep.subr.mxu1 %v343_v0 }
  0x16   :  { %290 = vmatpush3.msra.mxu0 %v29_v19  ;;  %323 = vmatpush3.msra.mxu1 %v125_v22 }
  0x17   :  { %291 = vmatprep.subr.mxu0 %v343_v0  ;;  %324 = vmatprep.subr.mxu1 %v343_v0 }
  0x18   :  { %292 = vmatpush3.msra.mxu0 %v28_v21  ;;  %325 = vmatpush3.msra.mxu1 %v124_v24 }
  0x19   :  { %293 = vmatprep.subr.mxu0 %v343_v0  ;;  %326 = vmatprep.subr.mxu1 %v343_v0 }
  0x1a   :  { %294 = vmatpush3.msra.mxu0 %v27_v23  ;;  %327 = vmatpush3.msra.mxu1 %v123_v26 }
  0x1b   :  { %295 = vmatprep.subr.mxu0 %v343_v0  ;;  %328 = vmatprep.subr.mxu1 %v343_v0 }
  0x1c   :  { %296 = vmatpush3.msra.mxu0 %v26_v25  ;;  %329 = vmatpush3.msra.mxu1 %v122_v28 }
  0x1d   :  { %297 = vmatprep.subr.mxu0 %v343_v0  ;;  %330 = vmatprep.subr.mxu1 %v343_v0 }
  0x1e   :  { %298 = vmatpush3.msra.mxu0 %v25_v27  ;;  %331 = vmatpush3.msra.mxu1 %v121_v31 }
  0x1f   :  { %299 = vmatprep.subr.mxu0 %v343_v0  ;;  %332 = vmatprep.subr.mxu1 %v343_v0 }
  0x20   :  { %300 = vmatpush3.msra.mxu0 %v24_v29  ;;  %333 = vmatpush3.msra.mxu1 %v120_v32 }
  0x21   :  { %302 = vmatmul.mubr.f32.vlgmr.msra.gmra.mxu0 %v23_v30  ;;  %334 = vmatprep.subr.mxu1 %v343_v0 }
  0x22   :  { %335 = vmatpush3.msra.mxu1 %v119_v33  ;;  %342 = vset.pattern.permute.xlu0 %v345_v43 }
  0xe1   :  { %v106_v34 = vpop.f32.mrf.mxu0 }
  0xe2   :  { %337 = vmatmul.mubr.f32.vlgmr.msra.gmra.mxu1 %v106_v34 }
  0xe3   :  { %v303_v35 = vpop.f32.mrf.mxu0 }
 0x1a2   :  { %v205_v37 = vpop.f32.mrf.mxu1 }
 0x1a3   :  { %v206_v38 = vadd.f32 %v232_v36, %v205_v37 }
 0x1a4   :  { %v338_v39 = vpop.f32.mrf.mxu1 }
 0x1a5   :  { %v209_v41 = vmax.f32 %v206_v38, 0.0 }
 0x1a7   :  { %v214_v42 = vmul.f32 %v233_v40, %v209_v41 }
 0x1a9   :  { %215 = vadd.xlane.f32.xlu0 %v214_v42 }
 0x232   :  { %v216_v45 = vpop.xlane.xlu0 %215 }
 0x233   :  { %v221_v46 = vadd.f32 %v234_v44, %v216_v45 }
 0x235   :  { %224 = vperm.xlu0 %342, %v221_v46  }
 0x2b0   :  { %v225_v47 = vpop.permute.xlu0 %224 }
 0x2b1   :  { %227 = vst [vmem:[%s520_s4] sm:$0xff] %v225_v47 }

// kernel: simple_gnn_forward.4
= control target key start
LH: loop header
LB: loop body
LE: loop exit
PB: predicated region body
PF: predicated region fallthrough
CT: control target
= control target key end

     0   :  { %s873_s1 = inlined_call_operand.vmem [shape: bf16[128,128], index: 1, kind: input, shape index: {}]   ;;  %s874_s0 = inlined_call_operand.vmem [shape: bf16[128,128], index: 0, kind: input, shape index: {}]   ;;  %s875_s2 = inlined_call_operand.vmem [shape: f32[128,128], index: 2, kind: input, shape index: {}]   ;;  %s876_s3 = inlined_call_operand.vmem [shape: f32[8,128], index: 3, kind: input, shape index: {}]   ;;  %s877_s4 = inlined_call_operand.vmem [shape: f32[128,128], index: 4, kind: output, shape index: {}]  }
   0x1   :  { %v685_v0 = vld [vmem:[%s873_s1 + $0x38] sm:$0xff]   ;;  %v686_v1 = vld [vmem:[%s873_s1 + $0x30] sm:$0xff]   ;;  %v687_v2 = vld [vmem:[%s873_s1 + $0x28] sm:$0xff]  }
   0x2   :  { %597 = vmatprep.subr.bf16.mxu0 %v685_v0  ;;  %v688_v3 = vld [vmem:[%s873_s1 + $0x20] sm:$0xff]   ;;  %v689_v5 = vld [vmem:[%s873_s1 + $0x18] sm:$0xff]   ;;  %v690_v6 = vld [vmem:[%s873_s1 + $0x10] sm:$0xff]  }
   0x3   :  { %598 = vmatpush3.bf16.msra.mxu0 %v685_v0  ;;  %v693_v4 = vld [vmem:[%s874_s0] sm:$0xff]   ;;  %v346_v7 = vld [vmem:[%s875_s2 + $0x78] sm:$0xff]  ;;  %v345_v8 = vld [vmem:[%s875_s2 + $0x70] sm:$0xff] }
   0x4   :  { %599 = vmatprep.subr.bf16.mxu0 %v686_v1  ;;  %613 = vmatprep.mubr.bf16.mxu0 %v693_v4  ;;  %v344_v9 = vld [vmem:[%s875_s2 + $0x68] sm:$0xff]  ;;  %v343_v11 = vld [vmem:[%s875_s2 + $0x60] sm:$0xff]  ;;  %v342_v12 = vld [vmem:[%s875_s2 + $0x58] sm:$0xff] }
   0x5   :  { %629 = vmatprep.subr.mxu1 %v346_v7  ;;  %v691_v10 = vld [vmem:[%s873_s1 + $0x8] sm:$0xff]   ;;  %v692_v13 = vld [vmem:[%s873_s1] sm:$0xff]   ;;  %v341_v14 = vld [vmem:[%s875_s2 + $0x50] sm:$0xff] }
   0x6   :  { %630 = vmatpush3.msra.mxu1 %v346_v7  ;;  %v340_v15 = vld [vmem:[%s875_s2 + $0x48] sm:$0xff]  ;;  %v339_v16 = vld [vmem:[%s875_s2 + $0x40] sm:$0xff]  ;;  %v338_v18 = vld [vmem:[%s875_s2 + $0x38] sm:$0xff] }
   0x7   :  { %600 = vmatpush3.bf16.msra.mxu0 %v686_v1  ;;  %631 = vmatprep.subr.mxu1 %v345_v8  ;;  %v694_v17 = vld [vmem:[%s874_s0 + $0x8] sm:$0xff]   ;;  %v695_v19 = vld [vmem:[%s874_s0 + $0x10] sm:$0xff]   ;;  %v335_v22 = vld [vmem:[%s875_s2 + $0x20] sm:$0xff] }
   0x8   :  { %601 = vmatprep.subr.bf16.mxu0 %v687_v2  ;;  %632 = vmatpush3.msra.mxu1 %v345_v8  ;;  %v337_v20 = vld [vmem:[%s875_s2 + $0x30] sm:$0xff]  ;;  %v336_v21 = vld [vmem:[%s875_s2 + $0x28] sm:$0xff]  ;;  %v696_v23 = vld [vmem:[%s874_s0 + $0x18] sm:$0xff]  }
   0x9   :  { %633 = vmatprep.subr.mxu1 %v344_v9  ;;  %v334_v24 = vld [vmem:[%s875_s2 + $0x18] sm:$0xff]  ;;  %v697_v25 = vld [vmem:[%s874_s0 + $0x20] sm:$0xff]   ;;  %v698_v26 = vld [vmem:[%s874_s0 + $0x28] sm:$0xff]  }
   0xa   :  { %634 = vmatpush3.msra.mxu1 %v344_v9  ;;  %v699_v27 = vld [vmem:[%s874_s0 + $0x30] sm:$0xff]   ;;  %v700_v28 = vld [vmem:[%s874_s0 + $0x38] sm:$0xff]   ;;  %v332_v30 = vld [vmem:[%s875_s2 + $0x8] sm:$0xff] }
   0xb   :  { %602 = vmatpush3.bf16.msra.mxu0 %v687_v2  ;;  %635 = vmatprep.subr.mxu1 %v343_v11  ;;  %v333_v29 = vld [vmem:[%s875_s2 + $0x10] sm:$0xff]  ;;  %v331_v31 = vld [vmem:[%s875_s2] sm:$0xff] }
   0xc   :  { %603 = vmatprep.subr.bf16.mxu0 %v688_v3  ;;  %636 = vmatpush3.msra.mxu1 %v343_v11  ;;  %v548_v48 = vld [vmem:[%s876_s3 + $0x1] ss:$0 sm:$0xff] }
   0xd   :  { %637 = vmatprep.subr.mxu1 %v342_v12 }
   0xe   :  { %638 = vmatpush3.msra.mxu1 %v342_v12 }
   0xf   :  { %604 = vmatpush3.bf16.msra.mxu0 %v688_v3  ;;  %639 = vmatprep.subr.mxu1 %v341_v14 }
  0x10   :  { %605 = vmatprep.subr.bf16.mxu0 %v689_v5  ;;  %640 = vmatpush3.msra.mxu1 %v341_v14 }
  0x11   :  { %641 = vmatprep.subr.mxu1 %v340_v15 }
  0x12   :  { %642 = vmatpush3.msra.mxu1 %v340_v15 }
  0x13   :  { %606 = vmatpush3.bf16.msra.mxu0 %v689_v5  ;;  %643 = vmatprep.subr.mxu1 %v339_v16 }
  0x14   :  { %607 = vmatprep.subr.bf16.mxu0 %v690_v6  ;;  %644 = vmatpush3.msra.mxu1 %v339_v16 }
  0x15   :  { %645 = vmatprep.subr.mxu1 %v338_v18 }
  0x16   :  { %646 = vmatpush3.msra.mxu1 %v338_v18 }
  0x17   :  { %608 = vmatpush3.bf16.msra.mxu0 %v690_v6  ;;  %647 = vmatprep.subr.mxu1 %v337_v20 }
  0x18   :  { %609 = vmatprep.subr.bf16.mxu0 %v691_v10  ;;  %648 = vmatpush3.msra.mxu1 %v337_v20 }
  0x19   :  { %649 = vmatprep.subr.mxu1 %v336_v21 }
  0x1a   :  { %650 = vmatpush3.msra.mxu1 %v336_v21 }
  0x1b   :  { %610 = vmatpush3.bf16.msra.mxu0 %v691_v10  ;;  %651 = vmatprep.subr.mxu1 %v335_v22 }
  0x1c   :  { %611 = vmatprep.subr.bf16.mxu0 %v692_v13  ;;  %652 = vmatpush3.msra.mxu1 %v335_v22 }
  0x1d   :  { %653 = vmatprep.subr.mxu1 %v334_v24 }
  0x1e   :  { %654 = vmatpush3.msra.mxu1 %v334_v24 }
  0x1f   :  { %612 = vmatpush3.bf16.msra.mxu0 %v692_v13  ;;  %655 = vmatprep.subr.mxu1 %v333_v29 }
  0x20   :  { %656 = vmatpush3.msra.mxu1 %v333_v29 }
  0x21   :  { %657 = vmatprep.subr.mxu1 %v332_v30 }
  0x22   :  { %614 = vmatmul.mubr.bf16.vlgmr.msra.gmra.mxu0 %v694_v17  ;;  %658 = vmatpush3.msra.mxu1 %v332_v30 }
  0x23   :  { %617 = vmatprep.mubr.bf16.mxu0 %v695_v19  ;;  %659 = vmatprep.subr.mxu1 %v331_v31 }
  0x24   :  { %660 = vmatpush3.msra.mxu1 %v331_v31 }
  0x2a   :  { %618 = vmatmul.mubr.bf16.gmra.mxu0 %v696_v23 }
  0x2b   :  { %621 = vmatprep.mubr.bf16.mxu0 %v697_v25 }
  0x32   :  { %622 = vmatmul.mubr.bf16.gmra.mxu0 %v698_v26 }
  0x33   :  { %625 = vmatprep.mubr.bf16.mxu0 %v699_v27 }
  0x3a   :  { %626 = vmatmul.mubr.bf16.gmra.mxu0 %v700_v28 }
  0xe2   :  { %v615_v32 = vpop.f32.mrf.mxu0 }
  0xe4   :  { %v216_v33 = vpop.f32.mrf.mxu0 }
  0xe5   :  { %661 = vmatprep.mubr.f32.mxu1 %v216_v33 }
  0xe6   :  { %v616_v34 = vpop.f32.mrf.mxu0 }
  0xe8   :  { %v219_v35 = vpop.f32.mrf.mxu0 }
  0xe9   :  { %662 = vmatmul.mubr.f32.vlgmr.msra.gmra.mxu1 %v219_v35 }
  0xea   :  { %v619_v36 = vpop.f32.mrf.mxu0  ;;  %664 = vmatprep.mubr.f32.mxu1 %v615_v32 }
  0xec   :  { %v232_v37 = vpop.f32.mrf.mxu0 }
  0xed   :  { %665 = vmatmul.mubr.f32.gmra.mxu1 %v616_v34 }
  0xee   :  { %v620_v38 = vpop.f32.mrf.mxu0  ;;  %667 = vmatprep.mubr.f32.mxu1 %v232_v37 }
  0xf0   :  { %v235_v39 = vpop.f32.mrf.mxu0 }
  0xf1   :  { %668 = vmatmul.mubr.f32.gmra.mxu1 %v235_v39 }
  0xf2   :  { %v623_v40 = vpop.f32.mrf.mxu0  ;;  %670 = vmatprep.mubr.f32.mxu1 %v619_v36 }
  0xf4   :  { %v248_v41 = vpop.f32.mrf.mxu0 }
  0xf5   :  { %671 = vmatmul.mubr.f32.gmra.mxu1 %v620_v38 }
  0xf6   :  { %v624_v42 = vpop.f32.mrf.mxu0  ;;  %673 = vmatprep.mubr.f32.mxu1 %v248_v41 }
  0xf8   :  { %v251_v43 = vpop.f32.mrf.mxu0 }
  0xf9   :  { %674 = vmatmul.mubr.f32.gmra.mxu1 %v251_v43 }
  0xfa   :  { %v627_v44 = vpop.f32.mrf.mxu0  ;;  %676 = vmatprep.mubr.f32.mxu1 %v623_v40 }
  0xfc   :  { %v264_v45 = vpop.f32.mrf.mxu0 }
  0xfd   :  { %677 = vmatmul.mubr.f32.gmra.mxu1 %v624_v42 }
  0xfe   :  { %v628_v46 = vpop.f32.mrf.mxu0  ;;  %679 = vmatprep.mubr.f32.mxu1 %v264_v45 }
 0x100   :  { %v267_v47 = vpop.f32.mrf.mxu0 }
 0x101   :  { %680 = vmatmul.mubr.f32.gmra.mxu1 %v267_v47 }
 0x102   :  { %682 = vmatprep.mubr.f32.mxu1 %v627_v44 }
 0x105   :  { %683 = vmatmul.mubr.f32.gmra.mxu1 %v628_v46 }
 0x1a9   :  { %v663_v49 = vpop.f32.mrf.mxu1 }
 0x1aa   :  { %v423_v50 = vadd.f32 %v663_v49, %v548_v48 }
 0x1ab   :  { %v417_v51 = vpop.f32.mrf.mxu1 }
 0x1ac   :  { %v497_v52 = vmax.f32 %v423_v50, 0.0  ;;  %v418_v53 = vadd.f32 %v548_v48, %v417_v51 }
 0x1ad   :  { %v666_v54 = vpop.f32.mrf.mxu1 }
 0x1ae   :  { %513 = vst [vmem:[%s877_s4 + $0x8] sm:$0xff] %v497_v52  ;;  %v496_v55 = vmax.f32 %v418_v53, 0.0  ;;  %v433_v56 = vadd.f32 %v666_v54, %v548_v48 }
 0x1af   :  { %v427_v57 = vpop.f32.mrf.mxu1 }
 0x1b0   :  { %512 = vst [vmem:[%s877_s4] sm:$0xff] %v496_v55  ;;  %v499_v58 = vmax.f32 %v433_v56, 0.0  ;;  %v428_v59 = vadd.f32 %v548_v48, %v427_v57 }
 0x1b1   :  { %v669_v60 = vpop.f32.mrf.mxu1 }
 0x1b2   :  { %515 = vst [vmem:[%s877_s4 + $0x18] sm:$0xff] %v499_v58  ;;  %v498_v61 = vmax.f32 %v428_v59, 0.0  ;;  %v443_v62 = vadd.f32 %v669_v60, %v548_v48 }
 0x1b3   :  { %v437_v63 = vpop.f32.mrf.mxu1 }
 0x1b4   :  { %514 = vst [vmem:[%s877_s4 + $0x10] sm:$0xff] %v498_v61  ;;  %v501_v0 = vmax.f32 %v443_v62, 0.0  ;;  %v438_v1 = vadd.f32 %v548_v48, %v437_v63 }
 0x1b5   :  { %v672_v2 = vpop.f32.mrf.mxu1 }
 0x1b6   :  { %517 = vst [vmem:[%s877_s4 + $0x28] sm:$0xff] %v501_v0  ;;  %v500_v3 = vmax.f32 %v438_v1, 0.0  ;;  %v453_v4 = vadd.f32 %v672_v2, %v548_v48 }
 0x1b7   :  { %v447_v5 = vpop.f32.mrf.mxu1 }
 0x1b8   :  { %516 = vst [vmem:[%s877_s4 + $0x20] sm:$0xff] %v500_v3  ;;  %v503_v6 = vmax.f32 %v453_v4, 0.0  ;;  %v448_v7 = vadd.f32 %v548_v48, %v447_v5 }
 0x1b9   :  { %v675_v8 = vpop.f32.mrf.mxu1 }
 0x1ba   :  { %519 = vst [vmem:[%s877_s4 + $0x38] sm:$0xff] %v503_v6  ;;  %v502_v9 = vmax.f32 %v448_v7, 0.0  ;;  %v463_v10 = vadd.f32 %v675_v8, %v548_v48 }
 0x1bb   :  { %v457_v11 = vpop.f32.mrf.mxu1 }
 0x1bc   :  { %518 = vst [vmem:[%s877_s4 + $0x30] sm:$0xff] %v502_v9  ;;  %v505_v12 = vmax.f32 %v463_v10, 0.0  ;;  %v458_v13 = vadd.f32 %v548_v48, %v457_v11 }
 0x1bd   :  { %v678_v14 = vpop.f32.mrf.mxu1 }
 0x1be   :  { %521 = vst [vmem:[%s877_s4 + $0x48] sm:$0xff] %v505_v12  ;;  %v504_v15 = vmax.f32 %v458_v13, 0.0  ;;  %v473_v16 = vadd.f32 %v678_v14, %v548_v48 }
 0x1bf   :  { %v467_v17 = vpop.f32.mrf.mxu1 }
 0x1c0   :  { %520 = vst [vmem:[%s877_s4 + $0x40] sm:$0xff] %v504_v15  ;;  %v507_v18 = vmax.f32 %v473_v16, 0.0  ;;  %v468_v19 = vadd.f32 %v548_v48, %v467_v17 }
 0x1c1   :  { %v681_v20 = vpop.f32.mrf.mxu1 }
 0x1c2   :  { %523 = vst [vmem:[%s877_s4 + $0x58] sm:$0xff] %v507_v18  ;;  %v506_v21 = vmax.f32 %v468_v19, 0.0  ;;  %v483_v22 = vadd.f32 %v681_v20, %v548_v48 }
 0x1c3   :  { %v477_v23 = vpop.f32.mrf.mxu1 }
 0x1c4   :  { %522 = vst [vmem:[%s877_s4 + $0x50] sm:$0xff] %v506_v21  ;;  %v509_v24 = vmax.f32 %v483_v22, 0.0  ;;  %v478_v25 = vadd.f32 %v548_v48, %v477_v23 }
 0x1c5   :  { %v684_v26 = vpop.f32.mrf.mxu1 }
 0x1c6   :  { %525 = vst [vmem:[%s877_s4 + $0x68] sm:$0xff] %v509_v24  ;;  %v508_v27 = vmax.f32 %v478_v25, 0.0  ;;  %v493_v28 = vadd.f32 %v684_v26, %v548_v48 }
 0x1c7   :  { %v487_v29 = vpop.f32.mrf.mxu1 }
 0x1c8   :  { %524 = vst [vmem:[%s877_s4 + $0x60] sm:$0xff] %v508_v27  ;;  %v511_v30 = vmax.f32 %v493_v28, 0.0  ;;  %v488_v31 = vadd.f32 %v548_v48, %v487_v29 }
 0x1ca   :  { %527 = vst [vmem:[%s877_s4 + $0x78] sm:$0xff] %v511_v30  ;;  %v510_v32 = vmax.f32 %v488_v31, 0.0 }
 0x1cc   :  { %526 = vst [vmem:[%s877_s4 + $0x70] sm:$0xff] %v510_v32 }

// kernel: simple_gnn_forward.3
= control target key start
LH: loop header
LB: loop body
LE: loop exit
PB: predicated region body
PF: predicated region fallthrough
CT: control target
= control target key end

     0   :  { %9 = vsyncpa [#allocation4], 0  ;;  %s884_s15 = smov [#allocation3]   ;;  %s990_s0 = inlined_call_operand.vmem [shape: bf16[128,128], index: 0, kind: input, shape index: {}]   ;;  %s991_s1 = inlined_call_operand.vmem [shape: bf16[128,128], index: 1, kind: input, shape index: {}]   ;;  %s992_s2 = inlined_call_operand.hbm [shape: f32[128,128], index: 2, kind: input, shape index: {}]   ;;  %s993_s3 = inlined_call_operand.vmem [shape: f32[8,128], index: 3, kind: input, shape index: {}]   ;;  %s994_s4 = inlined_call_operand.vmem [shape: bf16[128,128], index: 4, kind: output, shape index: {}]  }
   0x1   :  { %s19_s16 = sshll.u32 %s884_s15, 4  ;;  %s20_s16 = int_to_ptr.vmem [resolvable:$true] %s19_s16 }
   0x2   :  { %s870_s17 = scalar_lea.vmem %s20_s16, 2048  ;;  %p875_p1 = scmp.lt.s32.totalorder %s20_s16, %s20_s16 }
   0x3   :  { %p871_p0 = scmp.ne.s32.totalorder %s20_s16, %s870_s17  ;;  %p876_p2 = scmp.lt.s32.totalorder %s870_s17, %s870_s17 }
   0x5   :  { %p877_p3 = por %p876_p2, %p875_p1 }
   0x7   :  { %p878_p4 = pnand %p877_p3, %p871_p0 }
   0x9   :  { %881 = shalt.err (!%p878_p4)
}
   0xa   :  { %s885_s18 = smov 128   ;;  %s886_s19 = smov 8  }
   0xb   :  { %25 = dma.hbm_to_vmem [thread:$0]  %s992_s2, 2048, %s20_s16, [#allocation4], %s885_s18, %s885_s18, %s886_s19  }
   0xc   :  { %882 = dma.done.wait [#allocation4], 2048  }
   0xd   :  { %883 = vsyncadd [#allocation4], 4294965248  ;;  %v846_v0 = vld [vmem:[%s991_s1 + $0x38] sm:$0xff]   ;;  %v847_v1 = vld [vmem:[%s991_s1 + $0x30] sm:$0xff]  }
   0xe   :  { %755 = vmatprep.subr.bf16.mxu0 %v846_v0  ;;  %v848_v2 = vld [vmem:[%s991_s1 + $0x28] sm:$0xff]   ;;  %v849_v3 = vld [vmem:[%s991_s1 + $0x20] sm:$0xff]   ;;  %v850_v5 = vld [vmem:[%s991_s1 + $0x18] sm:$0xff]  }
   0xf   :  { %756 = vmatpush3.bf16.msra.mxu0 %v846_v0  ;;  %v854_v4 = vld [vmem:[%s990_s0] sm:$0xff]   ;;  %v851_v6 = vld [vmem:[%s991_s1 + $0x10] sm:$0xff]   ;;  %v360_v7 = vld [vmem:[#allocation3 + $0x78] sm:$0xff] }
  0x10   :  { %757 = vmatprep.subr.bf16.mxu0 %v847_v1  ;;  %771 = vmatprep.mubr.bf16.mxu0 %v854_v4  ;;  %v359_v8 = vld [vmem:[#allocation3 + $0x70] sm:$0xff]  ;;  %v358_v9 = vld [vmem:[#allocation3 + $0x68] sm:$0xff]  ;;  %v357_v11 = vld [vmem:[#allocation3 + $0x60] sm:$0xff] }
  0x11   :  { %787 = vmatprep.subr.mxu1 %v360_v7  ;;  %v852_v10 = vld [vmem:[%s991_s1 + $0x8] sm:$0xff]   ;;  %v356_v12 = vld [vmem:[#allocation3 + $0x58] sm:$0xff]  ;;  %v853_v13 = vld [vmem:[%s991_s1] sm:$0xff]  }
  0x12   :  { %788 = vmatpush3.msra.mxu1 %v360_v7  ;;  %v355_v14 = vld [vmem:[#allocation3 + $0x50] sm:$0xff]  ;;  %v354_v15 = vld [vmem:[#allocation3 + $0x48] sm:$0xff]  ;;  %v353_v16 = vld [vmem:[#allocation3 + $0x40] sm:$0xff] }
  0x13   :  { %758 = vmatpush3.bf16.msra.mxu0 %v847_v1  ;;  %789 = vmatprep.subr.mxu1 %v359_v8  ;;  %v855_v17 = vld [vmem:[%s990_s0 + $0x8] sm:$0xff]   ;;  %v352_v18 = vld [vmem:[#allocation3 + $0x38] sm:$0xff]  ;;  %v856_v19 = vld [vmem:[%s990_s0 + $0x10] sm:$0xff]  }
  0x14   :  { %759 = vmatprep.subr.bf16.mxu0 %v848_v2  ;;  %790 = vmatpush3.msra.mxu1 %v359_v8  ;;  %v351_v20 = vld [vmem:[#allocation3 + $0x30] sm:$0xff]  ;;  %v350_v21 = vld [vmem:[#allocation3 + $0x28] sm:$0xff]  ;;  %v349_v22 = vld [vmem:[#allocation3 + $0x20] sm:$0xff] }
  0x15   :  { %791 = vmatprep.subr.mxu1 %v358_v9  ;;  %v857_v23 = vld [vmem:[%s990_s0 + $0x18] sm:$0xff]   ;;  %v858_v25 = vld [vmem:[%s990_s0 + $0x20] sm:$0xff]   ;;  %v859_v26 = vld [vmem:[%s990_s0 + $0x28] sm:$0xff]  }
  0x16   :  { %792 = vmatpush3.msra.mxu1 %v358_v9  ;;  %v348_v24 = vld [vmem:[#allocation3 + $0x18] sm:$0xff]  ;;  %v860_v27 = vld [vmem:[%s990_s0 + $0x30] sm:$0xff]   ;;  %v346_v30 = vld [vmem:[#allocation3 + $0x8] sm:$0xff] }
  0x17   :  { %760 = vmatpush3.bf16.msra.mxu0 %v848_v2  ;;  %793 = vmatprep.subr.mxu1 %v357_v11  ;;  %v861_v28 = vld [vmem:[%s990_s0 + $0x38] sm:$0xff]   ;;  %v347_v29 = vld [vmem:[#allocation3 + $0x10] sm:$0xff]  ;;  %v345_v31 = vld [vmem:[#allocation3] sm:$0xff] }
  0x18   :  { %761 = vmatprep.subr.bf16.mxu0 %v849_v3  ;;  %794 = vmatpush3.msra.mxu1 %v357_v11  ;;  %v627_v48 = vld [vmem:[%s993_s3] ss:$0 sm:$0xff] }
  0x19   :  { %795 = vmatprep.subr.mxu1 %v356_v12 }
  0x1a   :  { %796 = vmatpush3.msra.mxu1 %v356_v12 }
  0x1b   :  { %762 = vmatpush3.bf16.msra.mxu0 %v849_v3  ;;  %797 = vmatprep.subr.mxu1 %v355_v14 }
  0x1c   :  { %763 = vmatprep.subr.bf16.mxu0 %v850_v5  ;;  %798 = vmatpush3.msra.mxu1 %v355_v14 }
  0x1d   :  { %799 = vmatprep.subr.mxu1 %v354_v15 }
  0x1e   :  { %800 = vmatpush3.msra.mxu1 %v354_v15 }
  0x1f   :  { %764 = vmatpush3.bf16.msra.mxu0 %v850_v5  ;;  %801 = vmatprep.subr.mxu1 %v353_v16 }
  0x20   :  { %765 = vmatprep.subr.bf16.mxu0 %v851_v6  ;;  %802 = vmatpush3.msra.mxu1 %v353_v16 }
  0x21   :  { %803 = vmatprep.subr.mxu1 %v352_v18 }
  0x22   :  { %804 = vmatpush3.msra.mxu1 %v352_v18 }
  0x23   :  { %766 = vmatpush3.bf16.msra.mxu0 %v851_v6  ;;  %805 = vmatprep.subr.mxu1 %v351_v20 }
  0x24   :  { %767 = vmatprep.subr.bf16.mxu0 %v852_v10  ;;  %806 = vmatpush3.msra.mxu1 %v351_v20 }
  0x25   :  { %807 = vmatprep.subr.mxu1 %v350_v21 }
  0x26   :  { %808 = vmatpush3.msra.mxu1 %v350_v21 }
  0x27   :  { %768 = vmatpush3.bf16.msra.mxu0 %v852_v10  ;;  %809 = vmatprep.subr.mxu1 %v349_v22 }
  0x28   :  { %769 = vmatprep.subr.bf16.mxu0 %v853_v13  ;;  %810 = vmatpush3.msra.mxu1 %v349_v22 }
  0x29   :  { %811 = vmatprep.subr.mxu1 %v348_v24 }
  0x2a   :  { %812 = vmatpush3.msra.mxu1 %v348_v24 }
  0x2b   :  { %770 = vmatpush3.bf16.msra.mxu0 %v853_v13  ;;  %813 = vmatprep.subr.mxu1 %v347_v29 }
  0x2c   :  { %814 = vmatpush3.msra.mxu1 %v347_v29 }
  0x2d   :  { %815 = vmatprep.subr.mxu1 %v346_v30 }
  0x2e   :  { %772 = vmatmul.mubr.bf16.vlgmr.msra.gmra.mxu0 %v855_v17  ;;  %816 = vmatpush3.msra.mxu1 %v346_v30 }
  0x2f   :  { %775 = vmatprep.mubr.bf16.mxu0 %v856_v19  ;;  %817 = vmatprep.subr.mxu1 %v345_v31 }
  0x30   :  { %818 = vmatpush3.msra.mxu1 %v345_v31 }
  0x36   :  { %776 = vmatmul.mubr.bf16.gmra.mxu0 %v857_v23 }
  0x37   :  { %779 = vmatprep.mubr.bf16.mxu0 %v858_v25 }
  0x3e   :  { %780 = vmatmul.mubr.bf16.gmra.mxu0 %v859_v26 }
  0x3f   :  { %783 = vmatprep.mubr.bf16.mxu0 %v860_v27 }
  0x46   :  { %784 = vmatmul.mubr.bf16.gmra.mxu0 %v861_v28 }
  0xee   :  { %v773_v32 = vpop.f32.mrf.mxu0 }
  0xf0   :  { %v230_v33 = vpop.f32.mrf.mxu0 }
  0xf1   :  { %819 = vmatprep.mubr.f32.mxu1 %v230_v33 }
  0xf2   :  { %v774_v34 = vpop.f32.mrf.mxu0 }
  0xf4   :  { %v233_v35 = vpop.f32.mrf.mxu0 }
  0xf5   :  { %820 = vmatmul.mubr.f32.vlgmr.msra.gmra.mxu1 %v233_v35 }
  0xf6   :  { %v777_v36 = vpop.f32.mrf.mxu0  ;;  %822 = vmatprep.mubr.f32.mxu1 %v773_v32 }
  0xf8   :  { %v246_v37 = vpop.f32.mrf.mxu0 }
  0xf9   :  { %823 = vmatmul.mubr.f32.gmra.mxu1 %v774_v34 }
  0xfa   :  { %v778_v38 = vpop.f32.mrf.mxu0  ;;  %825 = vmatprep.mubr.f32.mxu1 %v246_v37 }
  0xfc   :  { %v249_v39 = vpop.f32.mrf.mxu0 }
  0xfd   :  { %826 = vmatmul.mubr.f32.gmra.mxu1 %v249_v39 }
  0xfe   :  { %v781_v40 = vpop.f32.mrf.mxu0  ;;  %828 = vmatprep.mubr.f32.mxu1 %v777_v36 }
 0x100   :  { %v262_v41 = vpop.f32.mrf.mxu0 }
 0x101   :  { %829 = vmatmul.mubr.f32.gmra.mxu1 %v778_v38 }
 0x102   :  { %v782_v42 = vpop.f32.mrf.mxu0  ;;  %831 = vmatprep.mubr.f32.mxu1 %v262_v41 }
 0x104   :  { %v265_v43 = vpop.f32.mrf.mxu0 }
 0x105   :  { %832 = vmatmul.mubr.f32.gmra.mxu1 %v265_v43 }
 0x106   :  { %v785_v44 = vpop.f32.mrf.mxu0  ;;  %834 = vmatprep.mubr.f32.mxu1 %v781_v40 }
 0x108   :  { %v278_v45 = vpop.f32.mrf.mxu0 }
 0x109   :  { %835 = vmatmul.mubr.f32.gmra.mxu1 %v782_v42 }
 0x10a   :  { %v786_v46 = vpop.f32.mrf.mxu0  ;;  %837 = vmatprep.mubr.f32.mxu1 %v278_v45 }
 0x10c   :  { %v281_v47 = vpop.f32.mrf.mxu0 }
 0x10d   :  { %838 = vmatmul.mubr.f32.gmra.mxu1 %v281_v47 }
 0x10e   :  { %840 = vmatprep.mubr.f32.mxu1 %v785_v44 }
 0x111   :  { %841 = vmatmul.mubr.f32.gmra.mxu1 %v786_v46 }
 0x1b5   :  { %v821_v49 = vpop.f32.mrf.mxu1 }
 0x1b6   :  { %v437_v50 = vadd.f32 %v821_v49, %v627_v48 }
 0x1b7   :  { %v431_v51 = vpop.f32.mrf.mxu1 }
 0x1b8   :  { %v432_v52 = vadd.f32 %v627_v48, %v431_v51  ;;  %v511_v54 = vmax.f32 %v437_v50, 0.0 }
 0x1b9   :  { %v824_v53 = vpop.f32.mrf.mxu1 }
 0x1ba   :  { %v510_v55 = vmax.f32 %v432_v52, 0.0  ;;  %v447_v56 = vadd.f32 %v824_v53, %v627_v48 }
 0x1bb   :  { %v441_v57 = vpop.f32.mrf.mxu1 }
 0x1bc   :  { %v663_v58 = vpack.c.bf16 %v511_v54, %v510_v55  ;;  %v442_v59 = vadd.f32 %v627_v48, %v441_v57  ;;  %v513_v61 = vmax.f32 %v447_v56, 0.0 }
 0x1bd   :  { %v827_v60 = vpop.f32.mrf.mxu1 }
 0x1be   :  { %664 = vst [vmem:[%s994_s4] sm:$0xff] %v663_v58   ;;  %v512_v62 = vmax.f32 %v442_v59, 0.0  ;;  %v457_v63 = vadd.f32 %v827_v60, %v627_v48 }
 0x1bf   :  { %v451_v0 = vpop.f32.mrf.mxu1 }
 0x1c0   :  { %v668_v1 = vpack.c.bf16 %v513_v61, %v512_v62  ;;  %v452_v2 = vadd.f32 %v627_v48, %v451_v0  ;;  %v515_v4 = vmax.f32 %v457_v63, 0.0 }
 0x1c1   :  { %v830_v3 = vpop.f32.mrf.mxu1 }
 0x1c2   :  { %700 = vst [vmem:[%s994_s4 + $0x8] sm:$0xff] %v668_v1   ;;  %v514_v5 = vmax.f32 %v452_v2, 0.0  ;;  %v467_v6 = vadd.f32 %v830_v3, %v627_v48 }
 0x1c3   :  { %v461_v7 = vpop.f32.mrf.mxu1 }
 0x1c4   :  { %v673_v8 = vpack.c.bf16 %v515_v4, %v514_v5  ;;  %v462_v9 = vadd.f32 %v627_v48, %v461_v7  ;;  %v517_v11 = vmax.f32 %v467_v6, 0.0 }
 0x1c5   :  { %v833_v10 = vpop.f32.mrf.mxu1 }
 0x1c6   :  { %701 = vst [vmem:[%s994_s4 + $0x10] sm:$0xff] %v673_v8   ;;  %v516_v12 = vmax.f32 %v462_v9, 0.0  ;;  %v477_v13 = vadd.f32 %v833_v10, %v627_v48 }
 0x1c7   :  { %v471_v14 = vpop.f32.mrf.mxu1 }
 0x1c8   :  { %v678_v15 = vpack.c.bf16 %v517_v11, %v516_v12  ;;  %v472_v16 = vadd.f32 %v627_v48, %v471_v14  ;;  %v519_v18 = vmax.f32 %v477_v13, 0.0 }
 0x1c9   :  { %v836_v17 = vpop.f32.mrf.mxu1 }
 0x1ca   :  { %702 = vst [vmem:[%s994_s4 + $0x18] sm:$0xff] %v678_v15   ;;  %v518_v19 = vmax.f32 %v472_v16, 0.0  ;;  %v487_v20 = vadd.f32 %v836_v17, %v627_v48 }
 0x1cb   :  { %v481_v21 = vpop.f32.mrf.mxu1 }
 0x1cc   :  { %v683_v22 = vpack.c.bf16 %v519_v18, %v518_v19  ;;  %v482_v23 = vadd.f32 %v627_v48, %v481_v21  ;;  %v521_v25 = vmax.f32 %v487_v20, 0.0 }
 0x1cd   :  { %v839_v24 = vpop.f32.mrf.mxu1 }
 0x1ce   :  { %703 = vst [vmem:[%s994_s4 + $0x20] sm:$0xff] %v683_v22   ;;  %v520_v26 = vmax.f32 %v482_v23, 0.0  ;;  %v497_v27 = vadd.f32 %v839_v24, %v627_v48 }
 0x1cf   :  { %v491_v28 = vpop.f32.mrf.mxu1 }
 0x1d0   :  { %v688_v29 = vpack.c.bf16 %v521_v25, %v520_v26  ;;  %v492_v30 = vadd.f32 %v627_v48, %v491_v28  ;;  %v523_v32 = vmax.f32 %v497_v27, 0.0 }
 0x1d1   :  { %v842_v31 = vpop.f32.mrf.mxu1 }
 0x1d2   :  { %704 = vst [vmem:[%s994_s4 + $0x28] sm:$0xff] %v688_v29   ;;  %v522_v33 = vmax.f32 %v492_v30, 0.0  ;;  %v507_v34 = vadd.f32 %v842_v31, %v627_v48 }
 0x1d3   :  { %v501_v35 = vpop.f32.mrf.mxu1 }
 0x1d4   :  { %v693_v36 = vpack.c.bf16 %v523_v32, %v522_v33  ;;  %v502_v37 = vadd.f32 %v627_v48, %v501_v35  ;;  %v525_v38 = vmax.f32 %v507_v34, 0.0 }
 0x1d6   :  { %705 = vst [vmem:[%s994_s4 + $0x30] sm:$0xff] %v693_v36   ;;  %v524_v39 = vmax.f32 %v502_v37, 0.0 }
 0x1d8   :  { %v698_v40 = vpack.c.bf16 %v525_v38, %v524_v39 }
 0x1da   :  { %706 = vst [vmem:[%s994_s4 + $0x38] sm:$0xff] %v698_v40  }
 0x1db   :  { %610 = vsyncpa [#allocation4], 1 }

</bundles_post_ra>
